<compile_context>
chip_gen: v7x
topology: tpu7x:2x2x1
jax: 0.10.0
libtpu: 0.0.40
codegen_flags: <defaults>
</compile_context>

<pallas_src>
import jax
import jax.numpy as jnp
from jax.experimental import pallas as pl
from jax.experimental.pallas import tpu as pltpu


PACK = 8  # batch rows packed into one lane-dense "wide" row


def _round_up(n, m):
    return ((n + m - 1) // m) * m


def _mlp_kernel(x_ref, w1_ref, b1_ref, w2_ref, b2_ref, o_ref):
    # x_ref:  (T, PACK*64)   lane-packed input rows
    # w1_ref: (PACK*64, PACK*32)  block-diagonal W1
    # b1_ref: (1, PACK*32)
    # w2_ref: (PACK*32, PACK*out) block-diagonal W2
    # b2_ref: (1, PACK*out)
    # o_ref:  (T, PACK*out)  lane-packed output rows
    x = x_ref[...]

    # Layer 1: Linear(64 -> 32) + Dropout(identity, eval mode) + ReLU
    h = jnp.dot(x, w1_ref[...], preferred_element_type=jnp.float32) + b1_ref[...]
    h = jnp.maximum(h, 0.0)

    # Layer 2: Linear(32 -> out) + Sigmoid (EUP logistic)
    z = jnp.dot(h, w2_ref[...], preferred_element_type=jnp.float32) + b2_ref[...]
    o_ref[...] = jax.nn.sigmoid(z).astype(o_ref.dtype)


def old_end_model_forward(x, w1, b1, w2, b2, *, tile_rows=4096, use_bf16=False):
    """Forward pass of OldEndModel (eval mode).

    x:  [B, 64] float32
    w1: [64, 32]  (transposed vs. PyTorch), b1: [32]
    w2: [32, out] (transposed vs. PyTorch), b2: [out]
    tile_rows: target original-batch rows per grid step (sweep 2048/4096/8192).
    """
    B, in_dim = x.shape
    hidden = w1.shape[1]
    out_dim = w2.shape[1]
    assert in_dim == 64 and w1.shape[0] == 64 and hidden == 32 and w2.shape[0] == 32

    # ---- choose the wide-row tile and grid -------------------------------
    wide_rows = pl.cdiv(B, PACK)                       # wide rows of real data
    max_tile = max(8, ((tile_rows // PACK) // 8) * 8)  # wide rows per step
    if wide_rows <= max_tile:
        # Everything fits in one tile; split in two (when there is enough
        # work) so both v7x TensorCores are used on the "parallel" axis.
        wide_tile = _round_up(pl.cdiv(wide_rows, 2), 8) if wide_rows > 8 else 8
    else:
        wide_tile = max_tile
    num_tiles = pl.cdiv(wide_rows, wide_tile)
    # Rebalance so the last tile is not mostly padding.
    wide_tile = _round_up(pl.cdiv(wide_rows, num_tiles), 8)
    num_tiles = pl.cdiv(wide_rows, wide_tile)

    wide_B = num_tiles * wide_tile
    B_pad = wide_B * PACK

    # ---- build lane-packed operands ---------------------------------------
    if B_pad != B:
        x = jnp.pad(x, ((0, B_pad - B), (0, 0)))       # ragged-batch padding
    x_wide = x.reshape(wide_B, PACK * in_dim)          # contiguous re-view

    eye = jnp.eye(PACK, dtype=w1.dtype)
    w1_big = jnp.kron(eye, w1)                         # (512, 256) block-diag
    w2_big = jnp.kron(eye, w2)                         # (256, PACK*out)
    b1_big = jnp.tile(b1, PACK).reshape(1, PACK * hidden)
    b2_big = jnp.tile(b2, PACK).reshape(1, PACK * out_dim)

    if use_bf16:
        # Halves the dominant x read; accumulation stays f32 in the kernel.
        x_wide = x_wide.astype(jnp.bfloat16)
        w1_big = w1_big.astype(jnp.bfloat16)

    out_wide = pl.pallas_call(
        _mlp_kernel,
        out_shape=jax.ShapeDtypeStruct((wide_B, PACK * out_dim), jnp.float32),
        grid_spec=pltpu.PrefetchScalarGridSpec(
            num_scalar_prefetch=0,
            grid=(num_tiles,),
            in_specs=[
                pl.BlockSpec((wide_tile, PACK * in_dim), lambda i: (i, 0)),      # x tile
                pl.BlockSpec((PACK * in_dim, PACK * hidden), lambda i: (0, 0)),  # W1 (full)
                pl.BlockSpec((1, PACK * hidden), lambda i: (0, 0)),              # b1
                pl.BlockSpec((PACK * hidden, PACK * out_dim), lambda i: (0, 0)), # W2 (full)
                pl.BlockSpec((1, PACK * out_dim), lambda i: (0, 0)),             # b2
            ],
            out_specs=pl.BlockSpec((wide_tile, PACK * out_dim), lambda i: (i, 0)),
        ),
        compiler_params=pltpu.CompilerParams(
            dimension_semantics=("parallel",),  # megacore sharding on v7x
        ),
    )(x_wide, w1_big, b1_big, w2_big, b2_big)

    # Contiguous re-view back to [B_pad, out_dim]; drop padded rows.
    return out_wide.reshape(B_pad, out_dim)[:B]


def init_params(key, out_dim):
    """Deterministic init mimicking PyTorch Linear's U(-1/sqrt(fan_in), 1/sqrt(fan_in))."""
    k1, k2, k3, k4 = jax.random.split(key, 4)
    bound1 = 1.0 / jnp.sqrt(64.0)
    bound2 = 1.0 / jnp.sqrt(32.0)
    # Stored transposed relative to PyTorch ([in, out]) so the kernel does x @ W.
    w1 = jax.random.uniform(k1, (64, 32), jnp.float32, -bound1, bound1)
    b1 = jax.random.uniform(k2, (32,), jnp.float32, -bound1, bound1)
    w2 = jax.random.uniform(k3, (32, out_dim), jnp.float32, -bound2, bound2)
    b2 = jax.random.uniform(k4, (out_dim,), jnp.float32, -bound2, bound2)
    return w1, b1, w2, b2


if __name__ == "__main__":
    key = jax.random.PRNGKey(0)
    k_x, k_x2, k_p = jax.random.split(key, 3)

    out_dim = 16  # OldEndModel(output=16)
    w1, b1, w2, b2 = init_params(k_p, out_dim)

    def reference(x):  # eval-mode dropout == identity
        h = jnp.maximum(x @ w1 + b1, 0.0)
        return jax.nn.sigmoid(h @ w2 + b2)

    # Small batch (pads internally to the 64-row packing quantum, single tile).
    x_small = jax.random.normal(k_x, (8, 64), jnp.float32)
    y_small = jax.block_until_ready(old_end_model_forward(x_small, w1, b1, w2, b2))
    assert y_small.shape == (8, out_dim)
    assert jnp.allclose(y_small, reference(x_small), atol=2e-5, rtol=1e-5)

    # Ragged batch exercising padding + a 2-step "parallel" grid.
    x_big = jax.random.normal(k_x2, (200, 64), jnp.float32)
    y_big = jax.block_until_ready(old_end_model_forward(x_big, w1, b1, w2, b2))
    assert y_big.shape == (200, out_dim)
    assert jnp.allclose(y_big, reference(x_big), atol=2e-5, rtol=1e-5)

    print("KERNEL_OK")
</pallas_src>

<mosaic_0001>
module attributes {stable_mosaic.version = 11 : i64} {
  func.func @_mlp_kernel(%arg0: i32, %arg1: memref<8x512xf32, #tpu.memory_space<vmem>>, %arg2: memref<512x256xf32, #tpu.memory_space<vmem>>, %arg3: memref<1x256xf32, #tpu.memory_space<vmem>>, %arg4: memref<256x128xf32, #tpu.memory_space<vmem>>, %arg5: memref<1x128xf32, #tpu.memory_space<vmem>>, %arg6: memref<8x128xf32, #tpu.memory_space<vmem>>) attributes {dimension_semantics = [#tpu.dimension_semantics<parallel>], iteration_bounds = array<i64: 1>, scalar_prefetch = 0 : i64, scratch_operands = 0 : i64, tpu.core_type = #tpu.core_type<tc>, window_params = [{transform_indices = @transform_0, window_bounds = array<i64: 8, 512>}, {pipeline_mode = #tpu.pipeline_mode<synchronous>, transform_indices = @transform_1, window_bounds = array<i64: 512, 256>}, {pipeline_mode = #tpu.pipeline_mode<synchronous>, transform_indices = @transform_2, window_bounds = array<i64: 1, 256>}, {pipeline_mode = #tpu.pipeline_mode<synchronous>, transform_indices = @transform_3, window_bounds = array<i64: 256, 128>}, {pipeline_mode = #tpu.pipeline_mode<synchronous>, transform_indices = @transform_4, window_bounds = array<i64: 1, 128>}, {transform_indices = @transform_5, window_bounds = array<i64: 8, 128>}]} {
    %c0 = arith.constant 0 : index
    %c0_0 = arith.constant 0 : index
    %0 = vector.load %arg1[%c0, %c0_0] : memref<8x512xf32, #tpu.memory_space<vmem>>, vector<8x512xf32>
    %c0_1 = arith.constant 0 : index
    %c0_2 = arith.constant 0 : index
    %1 = vector.load %arg2[%c0_1, %c0_2] : memref<512x256xf32, #tpu.memory_space<vmem>>, vector<512x256xf32>
    %cst = arith.constant dense<0.000000e+00> : vector<8x256xf32>
    %2 = tpu.matmul %0, %1, %cst {dimension_numbers = #tpu.dot_dimension_numbers<[1], [0], [0], [1], [0, 0, 1, 1], [], []>} : vector<8x512xf32>, vector<512x256xf32>, vector<8x256xf32> -> vector<8x256xf32>
    %c0_3 = arith.constant 0 : index
    %c0_4 = arith.constant 0 : index
    %3 = vector.load %arg3[%c0_3, %c0_4] : memref<1x256xf32, #tpu.memory_space<vmem>>, vector<1x256xf32>
    %4 = vector.broadcast %3 : vector<1x256xf32> to vector<8x256xf32>
    %5 = arith.addf %2, %4 : vector<8x256xf32>
    %cst_5 = arith.constant 0.000000e+00 : f32
    %6 = vector.broadcast %cst_5 : f32 to vector<8x256xf32>
    %7 = arith.maximumf %5, %6 : vector<8x256xf32>
    %c0_6 = arith.constant 0 : index
    %c0_7 = arith.constant 0 : index
    %8 = vector.load %arg4[%c0_6, %c0_7] : memref<256x128xf32, #tpu.memory_space<vmem>>, vector<256x128xf32>
    %cst_8 = arith.constant dense<0.000000e+00> : vector<8x128xf32>
    %9 = tpu.matmul %7, %8, %cst_8 {dimension_numbers = #tpu.dot_dimension_numbers<[1], [0], [0], [1], [0, 0, 1, 1], [], []>} : vector<8x256xf32>, vector<256x128xf32>, vector<8x128xf32> -> vector<8x128xf32>
    %c0_9 = arith.constant 0 : index
    %c0_10 = arith.constant 0 : index
    %10 = vector.load %arg5[%c0_9, %c0_10] : memref<1x128xf32, #tpu.memory_space<vmem>>, vector<1x128xf32>
    %11 = vector.broadcast %10 : vector<1x128xf32> to vector<8x128xf32>
    %12 = arith.addf %9, %11 : vector<8x128xf32>
    %13 = arith.negf %12 : vector<8x128xf32>
    %14 = math.exp %13 : vector<8x128xf32>
    %cst_11 = arith.constant 1.000000e+00 : f32
    %15 = vector.broadcast %cst_11 : f32 to vector<8x128xf32>
    %16 = arith.addf %15, %14 : vector<8x128xf32>
    %17 = arith.divf %15, %16 : vector<8x128xf32>
    %c0_12 = arith.constant 0 : index
    %c0_13 = arith.constant 0 : index
    %18 = vector.load %arg6[%c0_12, %c0_13] : memref<8x128xf32, #tpu.memory_space<vmem>>, vector<8x128xf32>
    tpu.vector_store %arg6[%c0_12, %c0_13], %17 {strides = array<i32>} : memref<8x128xf32, #tpu.memory_space<vmem>>, vector<8x128xf32>,
    return
  }
  func.func @transform_0(%arg0: i32) -> (i32, i32) {
    %c0_i32 = arith.constant 0 : i32
    %c0_i32_0 = arith.constant 0 : i32
    return %arg0, %c0_i32 : i32, i32
  }
  func.func @transform_1(%arg0: i32) -> (i32, i32) {
    %c0_i32 = arith.constant 0 : i32
    %c0_i32_0 = arith.constant 0 : i32
    %c0_i32_1 = arith.constant 0 : i32
    return %c0_i32, %c0_i32_0 : i32, i32
  }
  func.func @transform_2(%arg0: i32) -> (i32, i32) {
    %c0_i32 = arith.constant 0 : i32
    %c0_i32_0 = arith.constant 0 : i32
    %c0_i32_1 = arith.constant 0 : i32
    return %c0_i32, %c0_i32_0 : i32, i32
  }
  func.func @transform_3(%arg0: i32) -> (i32, i32) {
    %c0_i32 = arith.constant 0 : i32
    %c0_i32_0 = arith.constant 0 : i32
    %c0_i32_1 = arith.constant 0 : i32
    return %c0_i32, %c0_i32_0 : i32, i32
  }
  func.func @transform_4(%arg0: i32) -> (i32, i32) {
    %c0_i32 = arith.constant 0 : i32
    %c0_i32_0 = arith.constant 0 : i32
    %c0_i32_1 = arith.constant 0 : i32
    return %c0_i32, %c0_i32_0 : i32, i32
  }
  func.func @transform_5(%arg0: i32) -> (i32, i32) {
    %c0_i32 = arith.constant 0 : i32
    %c0_i32_0 = arith.constant 0 : i32
    return %arg0, %c0_i32 : i32, i32
  }
}

</mosaic_0001>

<bundles_post_ra>
// kernel: tpu_custom_call.1
= control target key start
LH: loop header
LB: loop body
LE: loop exit
PB: predicated region body
PF: predicated region fallthrough
CT: control target
= control target key end

     0   :  { %10 = vsyncpa [#allocation3], 0  ;;  %s879_s0 = inlined_call_operand.hbm [shape: f32[8,512], index: 0, kind: input, shape index: {}]   ;;  %s880_s1 = inlined_call_operand.hbm [shape: f32[512,256], index: 1, kind: input, shape index: {}]   ;;  %s881_s2 = inlined_call_operand.vmem [shape: f32[1,256], index: 2, kind: input, shape index: {}]   ;;  %s882_s3 = inlined_call_operand.hbm [shape: f32[256,128], index: 3, kind: input, shape index: {}]   ;;  %s883_s4 = inlined_call_operand.vmem [shape: f32[1,128], index: 4, kind: input, shape index: {}]   ;;  %s884_s5 = inlined_call_operand.hbm [shape: f32[8,128], index: 5, kind: output, shape index: {}]  }
   0x1   :  { %11 = vsyncpa [#allocation6], 0 }
   0x2   :  { %12 = vsyncpa [#allocation4], 0  ;;  %s787_s18 = smov [#allocation5]   ;;  %s693_s22 = scalar_lea.hbm %s880_s1, 16384 }
   0x3   :  { %s28_s19 = sshll.u32 %s787_s18, 4  ;;  %p694_p0 = scmp.ne.s32.totalorder %s880_s1, %s693_s22  ;;  %s29_s19 = int_to_ptr.vmem [resolvable:$true] %s28_s19 }
   0x4   :  { %p697_p1 = scmp.lt.u32.totalorder %s693_s22, %s880_s1 }
   0x6   :  { %p699_p2 = pnand %p697_p1, %p694_p0 }
   0x8   :  { %702 = shalt.err (!%p699_p2)
}
   0x9   :  { %s703_s27 = scalar_lea.vmem %s29_s19, 16384  ;;  %p708_p4 = scmp.lt.s32.totalorder %s29_s19, %s29_s19 }
   0xa   :  { %p704_p3 = scmp.ne.s32.totalorder %s29_s19, %s703_s27  ;;  %p709_p5 = scmp.lt.s32.totalorder %s703_s27, %s703_s27 }
   0xc   :  { %p710_p6 = por %p709_p5, %p708_p4 }
   0xe   :  { %p711_p7 = pnand %p710_p6, %p704_p3 }
  0x10   :  { %714 = shalt.err (!%p711_p7)
}
  0x11   :  { %s788_s28 = smov 256   ;;  %s789_s29 = smov 16  }
  0x12   :  { %34 = dma.hbm_to_vmem [thread:$0]  %s880_s1, 16384, %s29_s19, [#allocation6], %s788_s28, %s788_s28, %s789_s29  }
  0x13   :  { %s790_s7 = smov [#allocation2]   ;;  %s791_s9 = smov [#allocation7]  }
  0x14   :  { %s19_s8 = sshll.u32 %s790_s7, 4  ;;  %s42_s10 = sshll.u32 %s791_s9, 4  ;;  %s20_s8 = int_to_ptr.vmem [resolvable:$true] %s19_s8  ;;  %s43_s10 = int_to_ptr.vmem [resolvable:$true] %s42_s10 }
  0x15   :  { %s715_s13 = scalar_lea.hbm %s879_s0, 512 }
  0x16   :  { %p716_p8 = scmp.ne.s32.totalorder %s879_s0, %s715_s13  ;;  %p719_p9 = scmp.lt.u32.totalorder %s715_s13, %s879_s0 }
  0x18   :  { %p721_p10 = pnand %p719_p9, %p716_p8 }
  0x1a   :  { %724 = shalt.err (!%p721_p10)
}
  0x1b   :  { %s725_s1 = scalar_lea.vmem %s20_s8, 512  ;;  %p730_p12 = scmp.lt.s32.totalorder %s20_s8, %s20_s8 }
  0x1c   :  { %p726_p11 = scmp.ne.s32.totalorder %s20_s8, %s725_s1  ;;  %p731_p13 = scmp.lt.s32.totalorder %s725_s1, %s725_s1 }
  0x1e   :  { %p732_p0 = por %p731_p13, %p730_p12 }
  0x20   :  { %p733_p1 = pnand %p732_p0, %p726_p11 }
  0x22   :  { %736 = shalt.err (!%p733_p1)
}
  0x23   :  { %22 = dma.hbm_to_vmem [thread:$0]  %s879_s0, 512, %s20_s8, [#allocation3]  }
  0x24   :  { %s737_s22 = scalar_lea.hbm %s882_s3, 4096 }
  0x25   :  { %p738_p2 = scmp.ne.s32.totalorder %s882_s3, %s737_s22  ;;  %p741_p3 = scmp.lt.u32.totalorder %s737_s22, %s882_s3 }
  0x27   :  { %p743_p4 = pnand %p741_p3, %p738_p2 }
  0x29   :  { %746 = shalt.err (!%p743_p4)
}
  0x2a   :  { %s747_s27 = scalar_lea.vmem %s43_s10, 4096  ;;  %p752_p6 = scmp.lt.s32.totalorder %s43_s10, %s43_s10 }
  0x2b   :  { %p748_p5 = scmp.ne.s32.totalorder %s43_s10, %s747_s27  ;;  %p753_p7 = scmp.lt.s32.totalorder %s747_s27, %s747_s27 }
  0x2d   :  { %p754_p8 = por %p753_p7, %p752_p6 }
  0x2f   :  { %p755_p9 = pnand %p754_p8, %p748_p5 }
  0x31   :  { %758 = shalt.err (!%p755_p9)
}
  0x32   :  { %s792_s0 = smov 128   ;;  %s793_s28 = smov 8  }
  0x33   :  { %48 = dma.hbm_to_vmem [thread:$0]  %s882_s3, 4096, %s43_s10, [#allocation6], %s792_s0, %s792_s0, %s793_s28  }
  0x34   :  { %781 = dma.done.wait [#allocation3], 512  }
  0x35   :  { %782 = vsyncadd [#allocation3], 4294966784 }
  0x36   :  { %783 = dma.done.wait [#allocation6], 20480  }
  0x37   :  { %784 = vsyncadd [#allocation6], 4294946816  ;;  %v65_v0 = vld [vmem:[#allocation5 + $0x8] sm:$0xff]  ;;  %v67_v1 = vld [vmem:[#allocation5 + $0x18] sm:$0xff] }
  0x38   :  { %v64_v2 = vld [vmem:[#allocation5] sm:$0xff]  ;;  %v517_v3 = vpack.c.bf16 %v67_v1, %v65_v0  ;;  %v66_v4 = vld [vmem:[#allocation5 + $0x10] sm:$0xff]  ;;  %v129_v5 = vld [vmem:[#allocation5 + $0x208] sm:$0xff] }
  0x39   :  { %v131_v6 = vld [vmem:[#allocation5 + $0x218] sm:$0xff]  ;;  %v519_v7 = vpack.c.bf16 %v66_v4, %v64_v2  ;;  %v128_v9 = vld [vmem:[#allocation5 + $0x200] sm:$0xff]  ;;  %v130_v10 = vld [vmem:[#allocation5 + $0x210] sm:$0xff] }
  0x3a   :  { %v581_v8 = vpack.c.bf16 %v131_v6, %v129_v5  ;;  %v69_v11 = vld [vmem:[#allocation5 + $0x28] sm:$0xff]  ;;  %518 = vmatprep.subr.bf16.mxu1 %v517_v3  ;;  %v583_v12 = vpack.c.bf16 %v130_v10, %v128_v9  ;;  %v71_v13 = vld [vmem:[#allocation5 + $0x38] sm:$0xff]  ;;  %v68_v14 = vld [vmem:[#allocation5 + $0x20] sm:$0xff] }
  0x3b   :  { %v70_v15 = vld [vmem:[#allocation5 + $0x30] sm:$0xff]  ;;  %520 = vmatpush1.bf16.msra.mxu1 %v519_v7  ;;  %v521_v16 = vpack.c.bf16 %v71_v13, %v69_v11  ;;  %v133_v18 = vld [vmem:[#allocation5 + $0x228] sm:$0xff]  ;;  %v135_v19 = vld [vmem:[#allocation5 + $0x238] sm:$0xff] }
  0x3c   :  { %582 = vmatprep.subr.bf16.mxu0 %v581_v8  ;;  %v523_v17 = vpack.c.bf16 %v70_v15, %v68_v14  ;;  %v132_v20 = vld [vmem:[#allocation5 + $0x220] sm:$0xff]  ;;  %v585_v21 = vpack.c.bf16 %v135_v19, %v133_v18  ;;  %v134_v22 = vld [vmem:[#allocation5 + $0x230] sm:$0xff]  ;;  %v73_v23 = vld [vmem:[#allocation5 + $0x48] sm:$0xff] }
  0x3d   :  { %584 = vmatpush1.bf16.msra.mxu0 %v583_v12  ;;  %v75_v24 = vld [vmem:[#allocation5 + $0x58] sm:$0xff]  ;;  %522 = vmatprep.subr.bf16.mxu1 %v521_v16  ;;  %v587_v25 = vpack.c.bf16 %v134_v22, %v132_v20  ;;  %v72_v27 = vld [vmem:[#allocation5 + $0x40] sm:$0xff]  ;;  %v74_v28 = vld [vmem:[#allocation5 + $0x50] sm:$0xff] }
  0x3e   :  { %v525_v26 = vpack.c.bf16 %v75_v24, %v73_v23  ;;  %v137_v29 = vld [vmem:[#allocation5 + $0x248] sm:$0xff]  ;;  %586 = vmatprep.subr.bf16.mxu0 %v585_v21  ;;  %v139_v30 = vld [vmem:[#allocation5 + $0x258] sm:$0xff]  ;;  %v136_v31 = vld [vmem:[#allocation5 + $0x240] sm:$0xff]  ;;  %v527_v33 = vpack.c.bf16 %v74_v28, %v72_v27 }
  0x3f   :  { %v138_v32 = vld [vmem:[#allocation5 + $0x250] sm:$0xff]  ;;  %524 = vmatpush1.bf16.msra.mxu1 %v523_v17  ;;  %v589_v34 = vpack.c.bf16 %v139_v30, %v137_v29  ;;  %v77_v35 = vld [vmem:[#allocation5 + $0x68] sm:$0xff]  ;;  %v79_v36 = vld [vmem:[#allocation5 + $0x78] sm:$0xff] }
  0x40   :  { %v76_v37 = vld [vmem:[#allocation5 + $0x60] sm:$0xff]  ;;  %526 = vmatprep.subr.bf16.mxu1 %v525_v26  ;;  %v591_v38 = vpack.c.bf16 %v138_v32, %v136_v31  ;;  %v529_v39 = vpack.c.bf16 %v79_v36, %v77_v35  ;;  %v78_v40 = vld [vmem:[#allocation5 + $0x70] sm:$0xff]  ;;  %v141_v41 = vld [vmem:[#allocation5 + $0x268] sm:$0xff] }
  0x41   :  { %588 = vmatpush1.bf16.msra.mxu0 %v587_v25  ;;  %v143_v42 = vld [vmem:[#allocation5 + $0x278] sm:$0xff]  ;;  %v140_v44 = vld [vmem:[#allocation5 + $0x260] sm:$0xff]  ;;  %v142_v45 = vld [vmem:[#allocation5 + $0x270] sm:$0xff]  ;;  %v531_v48 = vpack.c.bf16 %v78_v40, %v76_v37 }
  0x42   :  { %590 = vmatprep.subr.bf16.mxu0 %v589_v34  ;;  %v593_v43 = vpack.c.bf16 %v143_v42, %v141_v41  ;;  %v81_v46 = vld [vmem:[#allocation5 + $0x88] sm:$0xff]  ;;  %v83_v47 = vld [vmem:[#allocation5 + $0x98] sm:$0xff]  ;;  %v595_v51 = vpack.c.bf16 %v142_v45, %v140_v44  ;;  %v80_v53 = vld [vmem:[#allocation5 + $0x80] sm:$0xff] }
  0x43   :  { %528 = vmatpush1.bf16.msra.mxu1 %v527_v33  ;;  %v145_v49 = vld [vmem:[#allocation5 + $0x288] sm:$0xff]  ;;  %v147_v50 = vld [vmem:[#allocation5 + $0x298] sm:$0xff]  ;;  %v533_v52 = vpack.c.bf16 %v83_v47, %v81_v46  ;;  %v82_v54 = vld [vmem:[#allocation5 + $0x90] sm:$0xff] }
  0x44   :  { %530 = vmatprep.subr.bf16.mxu1 %v529_v39  ;;  %v144_v55 = vld [vmem:[#allocation5 + $0x280] sm:$0xff]  ;;  %v597_v56 = vpack.c.bf16 %v147_v50, %v145_v49  ;;  %v146_v57 = vld [vmem:[#allocation5 + $0x290] sm:$0xff]  ;;  %v85_v58 = vld [vmem:[#allocation5 + $0xa8] sm:$0xff]  ;;  %v535_v62 = vpack.c.bf16 %v82_v54, %v80_v53 }
  0x45   :  { %592 = vmatpush1.bf16.msra.mxu0 %v591_v38  ;;  %v87_v59 = vld [vmem:[#allocation5 + $0xb8] sm:$0xff]  ;;  %v149_v60 = vld [vmem:[#allocation5 + $0x2a8] sm:$0xff]  ;;  %v599_v63 = vpack.c.bf16 %v146_v57, %v144_v55  ;;  %v84_v1 = vld [vmem:[#allocation5 + $0xa0] sm:$0xff] }
  0x46   :  { %594 = vmatprep.subr.bf16.mxu0 %v593_v43  ;;  %v151_v61 = vld [vmem:[#allocation5 + $0x2b8] sm:$0xff]  ;;  %v537_v0 = vpack.c.bf16 %v87_v59, %v85_v58  ;;  %v86_v2 = vld [vmem:[#allocation5 + $0xb0] sm:$0xff]  ;;  %v148_v3 = vld [vmem:[#allocation5 + $0x2a0] sm:$0xff] }
  0x47   :  { %532 = vmatpush1.bf16.msra.mxu1 %v531_v48  ;;  %v601_v4 = vpack.c.bf16 %v151_v61, %v149_v60  ;;  %v150_v5 = vld [vmem:[#allocation5 + $0x2b0] sm:$0xff]  ;;  %v89_v6 = vld [vmem:[#allocation5 + $0xc8] sm:$0xff]  ;;  %v91_v7 = vld [vmem:[#allocation5 + $0xd8] sm:$0xff]  ;;  %v539_v10 = vpack.c.bf16 %v86_v2, %v84_v1 }
  0x48   :  { %534 = vmatprep.subr.bf16.mxu1 %v533_v52  ;;  %v153_v8 = vld [vmem:[#allocation5 + $0x2c8] sm:$0xff]  ;;  %v155_v9 = vld [vmem:[#allocation5 + $0x2d8] sm:$0xff]  ;;  %v603_v11 = vpack.c.bf16 %v150_v5, %v148_v3  ;;  %v541_v12 = vpack.c.bf16 %v91_v7, %v89_v6  ;;  %v88_v13 = vld [vmem:[#allocation5 + $0xc0] sm:$0xff] }
  0x49   :  { %596 = vmatpush1.bf16.msra.mxu0 %v595_v51  ;;  %v90_v14 = vld [vmem:[#allocation5 + $0xd0] sm:$0xff]  ;;  %v152_v15 = vld [vmem:[#allocation5 + $0x2c0] sm:$0xff]  ;;  %v605_v16 = vpack.c.bf16 %v155_v9, %v153_v8  ;;  %v93_v18 = vld [vmem:[#allocation5 + $0xe8] sm:$0xff] }
  0x4a   :  { %598 = vmatprep.subr.bf16.mxu0 %v597_v56  ;;  %v154_v17 = vld [vmem:[#allocation5 + $0x2d0] sm:$0xff]  ;;  %v95_v19 = vld [vmem:[#allocation5 + $0xf8] sm:$0xff]  ;;  %v157_v20 = vld [vmem:[#allocation5 + $0x2e8] sm:$0xff]  ;;  %v543_v22 = vpack.c.bf16 %v90_v14, %v88_v13 }
  0x4b   :  { %536 = vmatpush1.bf16.msra.mxu1 %v535_v62  ;;  %v159_v21 = vld [vmem:[#allocation5 + $0x2f8] sm:$0xff]  ;;  %v607_v23 = vpack.c.bf16 %v154_v17, %v152_v15  ;;  %v545_v24 = vpack.c.bf16 %v95_v19, %v93_v18  ;;  %v92_v25 = vld [vmem:[#allocation5 + $0xe0] sm:$0xff]  ;;  %v94_v26 = vld [vmem:[#allocation5 + $0xf0] sm:$0xff] }
  0x4c   :  { %538 = vmatprep.subr.bf16.mxu1 %v537_v0  ;;  %v156_v27 = vld [vmem:[#allocation5 + $0x2e0] sm:$0xff]  ;;  %v609_v28 = vpack.c.bf16 %v159_v21, %v157_v20  ;;  %v158_v29 = vld [vmem:[#allocation5 + $0x2f0] sm:$0xff]  ;;  %v97_v30 = vld [vmem:[#allocation5 + $0x108] sm:$0xff]  ;;  %v547_v34 = vpack.c.bf16 %v94_v26, %v92_v25 }
  0x4d   :  { %600 = vmatpush1.bf16.msra.mxu0 %v599_v63  ;;  %v99_v31 = vld [vmem:[#allocation5 + $0x118] sm:$0xff]  ;;  %v161_v32 = vld [vmem:[#allocation5 + $0x308] sm:$0xff]  ;;  %v611_v35 = vpack.c.bf16 %v158_v29, %v156_v27  ;;  %v96_v37 = vld [vmem:[#allocation5 + $0x100] sm:$0xff] }
  0x4e   :  { %602 = vmatprep.subr.bf16.mxu0 %v601_v4  ;;  %v163_v33 = vld [vmem:[#allocation5 + $0x318] sm:$0xff]  ;;  %v549_v36 = vpack.c.bf16 %v99_v31, %v97_v30  ;;  %v98_v38 = vld [vmem:[#allocation5 + $0x110] sm:$0xff]  ;;  %v160_v39 = vld [vmem:[#allocation5 + $0x300] sm:$0xff] }
  0x4f   :  { %540 = vmatpush1.bf16.msra.mxu1 %v539_v10  ;;  %v613_v40 = vpack.c.bf16 %v163_v33, %v161_v32  ;;  %v162_v41 = vld [vmem:[#allocation5 + $0x310] sm:$0xff]  ;;  %v101_v42 = vld [vmem:[#allocation5 + $0x128] sm:$0xff]  ;;  %v103_v43 = vld [vmem:[#allocation5 + $0x138] sm:$0xff]  ;;  %v551_v46 = vpack.c.bf16 %v98_v38, %v96_v37 }
  0x50   :  { %542 = vmatprep.subr.bf16.mxu1 %v541_v12  ;;  %v165_v44 = vld [vmem:[#allocation5 + $0x328] sm:$0xff]  ;;  %v167_v45 = vld [vmem:[#allocation5 + $0x338] sm:$0xff]  ;;  %v615_v47 = vpack.c.bf16 %v162_v41, %v160_v39  ;;  %v553_v48 = vpack.c.bf16 %v103_v43, %v101_v42  ;;  %v100_v49 = vld [vmem:[#allocation5 + $0x120] sm:$0xff] }
  0x51   :  { %604 = vmatpush1.bf16.msra.mxu0 %v603_v11  ;;  %v102_v50 = vld [vmem:[#allocation5 + $0x130] sm:$0xff]  ;;  %v164_v51 = vld [vmem:[#allocation5 + $0x320] sm:$0xff]  ;;  %v617_v52 = vpack.c.bf16 %v167_v45, %v165_v44  ;;  %v105_v54 = vld [vmem:[#allocation5 + $0x148] sm:$0xff] }
  0x52   :  { %606 = vmatprep.subr.bf16.mxu0 %v605_v16  ;;  %v166_v53 = vld [vmem:[#allocation5 + $0x330] sm:$0xff]  ;;  %v107_v55 = vld [vmem:[#allocation5 + $0x158] sm:$0xff]  ;;  %v169_v56 = vld [vmem:[#allocation5 + $0x348] sm:$0xff]  ;;  %v555_v58 = vpack.c.bf16 %v102_v50, %v100_v49 }
  0x53   :  { %544 = vmatpush1.bf16.msra.mxu1 %v543_v22  ;;  %v171_v57 = vld [vmem:[#allocation5 + $0x358] sm:$0xff]  ;;  %v619_v59 = vpack.c.bf16 %v166_v53, %v164_v51  ;;  %v557_v60 = vpack.c.bf16 %v107_v55, %v105_v54  ;;  %v104_v61 = vld [vmem:[#allocation5 + $0x140] sm:$0xff]  ;;  %v106_v62 = vld [vmem:[#allocation5 + $0x150] sm:$0xff] }
  0x54   :  { %546 = vmatprep.subr.bf16.mxu1 %v545_v24  ;;  %v168_v63 = vld [vmem:[#allocation5 + $0x340] sm:$0xff]  ;;  %v621_v0 = vpack.c.bf16 %v171_v57, %v169_v56  ;;  %v170_v1 = vld [vmem:[#allocation5 + $0x350] sm:$0xff]  ;;  %v109_v2 = vld [vmem:[#allocation5 + $0x168] sm:$0xff]  ;;  %v559_v6 = vpack.c.bf16 %v106_v62, %v104_v61 }
  0x55   :  { %608 = vmatpush1.bf16.msra.mxu0 %v607_v23  ;;  %v111_v3 = vld [vmem:[#allocation5 + $0x178] sm:$0xff]  ;;  %v173_v4 = vld [vmem:[#allocation5 + $0x368] sm:$0xff]  ;;  %v108_v7 = vld [vmem:[#allocation5 + $0x160] sm:$0xff]  ;;  %v623_v8 = vpack.c.bf16 %v170_v1, %v168_v63 }
  0x56   :  { %610 = vmatprep.subr.bf16.mxu0 %v609_v28  ;;  %v175_v5 = vld [vmem:[#allocation5 + $0x378] sm:$0xff]  ;;  %v561_v9 = vpack.c.bf16 %v111_v3, %v109_v2  ;;  %v110_v10 = vld [vmem:[#allocation5 + $0x170] sm:$0xff]  ;;  %v172_v11 = vld [vmem:[#allocation5 + $0x360] sm:$0xff] }
  0x57   :  { %548 = vmatpush1.bf16.msra.mxu1 %v547_v34  ;;  %v174_v12 = vld [vmem:[#allocation5 + $0x370] sm:$0xff]  ;;  %v625_v13 = vpack.c.bf16 %v175_v5, %v173_v4  ;;  %v113_v14 = vld [vmem:[#allocation5 + $0x188] sm:$0xff]  ;;  %v115_v15 = vld [vmem:[#allocation5 + $0x198] sm:$0xff]  ;;  %v563_v20 = vpack.c.bf16 %v110_v10, %v108_v7 }
  0x58   :  { %550 = vmatprep.subr.bf16.mxu1 %v549_v36  ;;  %v61_v16 = vld [vmem:[#allocation2 + $0x8] sm:$0xff]  ;;  %v179_v18 = vld [vmem:[#allocation5 + $0x398] sm:$0xff]  ;;  %v627_v21 = vpack.c.bf16 %v174_v12, %v172_v11  ;;  %v565_v22 = vpack.c.bf16 %v115_v15, %v113_v14  ;;  %v112_v23 = vld [vmem:[#allocation5 + $0x180] sm:$0xff] }
  0x59   :  { %612 = vmatpush1.bf16.msra.mxu0 %v611_v35  ;;  %v177_v17 = vld [vmem:[#allocation5 + $0x388] sm:$0xff]  ;;  %268 = vmatprep.mubr.f32.mxu1 %v61_v16  ;;  %v63_v19 = vld [vmem:[#allocation2 + $0x18] sm:$0xff]  ;;  %v114_v24 = vld [vmem:[#allocation5 + $0x190] sm:$0xff] }
  0x5a   :  { %614 = vmatprep.subr.bf16.mxu0 %v613_v40  ;;  %339 = vmatprep.mubr.f32.mxu0 %v63_v19  ;;  %v176_v25 = vld [vmem:[#allocation5 + $0x380] sm:$0xff]  ;;  %v629_v26 = vpack.c.bf16 %v179_v18, %v177_v17  ;;  %v178_v27 = vld [vmem:[#allocation5 + $0x390] sm:$0xff]  ;;  %v117_v28 = vld [vmem:[#allocation5 + $0x1a8] sm:$0xff]  ;;  %v567_v32 = vpack.c.bf16 %v114_v24, %v112_v23 }
  0x5b   :  { %552 = vmatpush1.bf16.msra.mxu1 %v551_v46  ;;  %v119_v29 = vld [vmem:[#allocation5 + $0x1b8] sm:$0xff]  ;;  %v181_v30 = vld [vmem:[#allocation5 + $0x3a8] sm:$0xff]  ;;  %v631_v33 = vpack.c.bf16 %v178_v27, %v176_v25  ;;  %v116_v35 = vld [vmem:[#allocation5 + $0x1a0] sm:$0xff] }
  0x5c   :  { %554 = vmatprep.subr.bf16.mxu1 %v553_v48  ;;  %v183_v31 = vld [vmem:[#allocation5 + $0x3b8] sm:$0xff]  ;;  %v569_v34 = vpack.c.bf16 %v119_v29, %v117_v28  ;;  %v118_v36 = vld [vmem:[#allocation5 + $0x1b0] sm:$0xff]  ;;  %v180_v37 = vld [vmem:[#allocation5 + $0x3a0] sm:$0xff] }
  0x5d   :  { %616 = vmatpush1.bf16.msra.mxu0 %v615_v47  ;;  %v633_v38 = vpack.c.bf16 %v183_v31, %v181_v30  ;;  %v182_v39 = vld [vmem:[#allocation5 + $0x3b0] sm:$0xff]  ;;  %v121_v40 = vld [vmem:[#allocation5 + $0x1c8] sm:$0xff]  ;;  %v123_v41 = vld [vmem:[#allocation5 + $0x1d8] sm:$0xff]  ;;  %v571_v44 = vpack.c.bf16 %v118_v36, %v116_v35 }
  0x5e   :  { %618 = vmatprep.subr.bf16.mxu0 %v617_v52  ;;  %v185_v42 = vld [vmem:[#allocation5 + $0x3c8] sm:$0xff]  ;;  %v187_v43 = vld [vmem:[#allocation5 + $0x3d8] sm:$0xff]  ;;  %v635_v45 = vpack.c.bf16 %v182_v39, %v180_v37  ;;  %v573_v46 = vpack.c.bf16 %v123_v41, %v121_v40  ;;  %v120_v47 = vld [vmem:[#allocation5 + $0x1c0] sm:$0xff] }
  0x5f   :  { %556 = vmatpush1.bf16.msra.mxu1 %v555_v58  ;;  %v122_v48 = vld [vmem:[#allocation5 + $0x1d0] sm:$0xff]  ;;  %v184_v49 = vld [vmem:[#allocation5 + $0x3c0] sm:$0xff]  ;;  %v637_v50 = vpack.c.bf16 %v187_v43, %v185_v42  ;;  %v125_v52 = vld [vmem:[#allocation5 + $0x1e8] sm:$0xff] }
  0x60   :  { %558 = vmatprep.subr.bf16.mxu1 %v557_v60  ;;  %v186_v51 = vld [vmem:[#allocation5 + $0x3d0] sm:$0xff]  ;;  %v127_v53 = vld [vmem:[#allocation5 + $0x1f8] sm:$0xff]  ;;  %v189_v54 = vld [vmem:[#allocation5 + $0x3e8] sm:$0xff]  ;;  %v575_v56 = vpack.c.bf16 %v122_v48, %v120_v47 }
  0x61   :  { %620 = vmatpush1.bf16.msra.mxu0 %v619_v59  ;;  %v191_v55 = vld [vmem:[#allocation5 + $0x3f8] sm:$0xff]  ;;  %v639_v57 = vpack.c.bf16 %v186_v51, %v184_v49  ;;  %v577_v58 = vpack.c.bf16 %v127_v53, %v125_v52  ;;  %v124_v59 = vld [vmem:[#allocation5 + $0x1e0] sm:$0xff]  ;;  %v126_v60 = vld [vmem:[#allocation5 + $0x1f0] sm:$0xff]  ;;  %v194_v52 = vlaneseq }
  0x62   :  { %622 = vmatprep.subr.bf16.mxu0 %v621_v0  ;;  %v188_v61 = vld [vmem:[#allocation5 + $0x3e0] sm:$0xff]  ;;  %v641_v62 = vpack.c.bf16 %v191_v55, %v189_v54  ;;  %v190_v63 = vld [vmem:[#allocation5 + $0x3f0] sm:$0xff]  ;;  %v365_v1 = vld [vmem:[#allocation7 + $0x88] sm:$0xff]  ;;  %v579_v2 = vpack.c.bf16 %v126_v60, %v124_v59 }
  0x63   :  { %560 = vmatpush1.bf16.msra.mxu1 %v559_v6  ;;  %v364_v0 = vld [vmem:[#allocation7 + $0x80] sm:$0xff]  ;;  %v643_v3 = vpack.c.bf16 %v190_v63, %v188_v61  ;;  %v349_v6 = vld [vmem:[#allocation7 + $0x8] sm:$0xff]  ;;  %v366_v7 = vld [vmem:[#allocation7 + $0x90] sm:$0xff]  ;;  %v195_v53 = vshrl.u32 %v194_v52, 7 }
  0x64   :  { %562 = vmatprep.subr.bf16.mxu1 %v561_v9  ;;  %v645_v4 = vpack.c.bf16 %v365_v1, %v364_v0  ;;  %v348_v5 = vld [vmem:[#allocation7] sm:$0xff]  ;;  %v62_v11 = vld [vmem:[#allocation2 + $0x10] sm:$0xff]  ;;  %v351_v14 = vld [vmem:[#allocation7 + $0x18] sm:$0xff] }
  0x65   :  { %624 = vmatpush1.bf16.msra.mxu0 %v623_v8  ;;  %v367_v8 = vld [vmem:[#allocation7 + $0x98] sm:$0xff]  ;;  %v60_v9 = vld [vmem:[#allocation2] sm:$0xff]  ;;  %v647_v10 = vpack.c.bf16 %v349_v6, %v348_v5  ;;  %v369_v16 = vld [vmem:[#allocation7 + $0xa8] sm:$0xff]  ;;  %v196_v54 = vsub.s32 0, %v195_v53 }
  0x66   :  { %626 = vmatprep.subr.bf16.mxu0 %v625_v13  ;;  %v649_v12 = vpack.c.bf16 %v367_v8, %v366_v7  ;;  %v350_v13 = vld [vmem:[#allocation7 + $0x10] sm:$0xff]  ;;  %v368_v15 = vld [vmem:[#allocation7 + $0xa0] sm:$0xff]  ;;  %v373_v28 = vld [vmem:[#allocation7 + $0xc8] sm:$0xff] }
  0x67   :  { %564 = vmatpush1.bf16.msra.mxu1 %v563_v20  ;;  %v651_v17 = vpack.c.bf16 %v351_v14, %v350_v13  ;;  %v653_v18 = vpack.c.bf16 %v369_v16, %v368_v15  ;;  %v352_v19 = vld [vmem:[#allocation7 + $0x20] sm:$0xff]  ;;  %v353_v20 = vld [vmem:[#allocation7 + $0x28] sm:$0xff]  ;;  %v354_v25 = vld [vmem:[#allocation7 + $0x30] sm:$0xff] }
  0x68   :  { %566 = vmatprep.subr.bf16.mxu1 %v565_v22  ;;  %v371_v22 = vld [vmem:[#allocation7 + $0xb8] sm:$0xff]  ;;  %v655_v23 = vpack.c.bf16 %v353_v20, %v352_v19  ;;  %v372_v27 = vld [vmem:[#allocation7 + $0xc0] sm:$0xff]  ;;  %v358_v37 = vld [vmem:[#allocation7 + $0x50] sm:$0xff] }
  0x69   :  { %628 = vmatpush1.bf16.msra.mxu0 %v627_v21  ;;  %v370_v21 = vld [vmem:[#allocation7 + $0xb0] sm:$0xff]  ;;  %v661_v30 = vpack.c.bf16 %v373_v28, %v372_v27  ;;  %v356_v31 = vld [vmem:[#allocation7 + $0x40] sm:$0xff]  ;;  %v377_v41 = vld [vmem:[#allocation7 + $0xe8] sm:$0xff] }
  0x6a   :  { %630 = vmatprep.subr.bf16.mxu0 %v629_v26  ;;  %v657_v24 = vpack.c.bf16 %v371_v22, %v370_v21  ;;  %v355_v26 = vld [vmem:[#allocation7 + $0x38] sm:$0xff]  ;;  %v376_v40 = vld [vmem:[#allocation7 + $0xe0] sm:$0xff]  ;;  %v362_v49 = vld [vmem:[#allocation7 + $0x70] sm:$0xff] }
  0x6b   :  { %568 = vmatpush1.bf16.msra.mxu1 %v567_v32  ;;  %v659_v29 = vpack.c.bf16 %v355_v26, %v354_v25  ;;  %v357_v32 = vld [vmem:[#allocation7 + $0x48] sm:$0xff]  ;;  %v669_v42 = vpack.c.bf16 %v377_v41, %v376_v40  ;;  %v360_v43 = vld [vmem:[#allocation7 + $0x60] sm:$0xff]  ;;  %v379_v47 = vld [vmem:[#allocation7 + $0xf8] sm:$0xff] }
  0x6c   :  { %570 = vmatprep.subr.bf16.mxu1 %v569_v34  ;;  %v375_v34 = vld [vmem:[#allocation7 + $0xd8] sm:$0xff]  ;;  %v663_v35 = vpack.c.bf16 %v357_v32, %v356_v31  ;;  %v192_v55 = vld [vmem:[%s881_s2] sm:$0x3]  ;;  %s794_s2 = smov [#allocation8]  }
  0x6d   :  { %632 = vmatpush1.bf16.msra.mxu0 %v631_v33  ;;  %v374_v33 = vld [vmem:[#allocation7 + $0xd0] sm:$0xff]  ;;  %v480_v6 = vld [vmem:[%s883_s4] ss:$0 sm:$0xff]  ;;  %s470_s9 = sshll.u32 %s794_s2, 4  ;;  %s471_s9 = int_to_ptr.vmem [resolvable:$true] %s470_s9 }
  0x6e   :  { %634 = vmatprep.subr.bf16.mxu0 %v633_v38  ;;  %v665_v36 = vpack.c.bf16 %v375_v34, %v374_v33  ;;  %v359_v38 = vld [vmem:[#allocation7 + $0x58] sm:$0xff]  ;;  %s759_s10 = scalar_lea.vmem %s471_s9, 128  ;;  %p764_p11 = scmp.lt.s32.totalorder %s471_s9, %s471_s9 }
  0x6f   :  { %572 = vmatpush1.bf16.msra.mxu1 %v571_v44  ;;  %v667_v39 = vpack.c.bf16 %v359_v38, %v358_v37  ;;  %v361_v44 = vld [vmem:[#allocation7 + $0x68] sm:$0xff]  ;;  %p760_p10 = scmp.ne.s32.totalorder %s471_s9, %s759_s10  ;;  %p765_p12 = scmp.lt.s32.totalorder %s759_s10, %s759_s10 }
  0x70   :  { %574 = vmatprep.subr.bf16.mxu1 %v573_v46  ;;  %v378_v46 = vld [vmem:[#allocation7 + $0xf0] sm:$0xff] }
  0x71   :  { %636 = vmatpush1.bf16.msra.mxu0 %v635_v45  ;;  %v671_v45 = vpack.c.bf16 %v361_v44, %v360_v43  ;;  %v673_v48 = vpack.c.bf16 %v379_v47, %v378_v46  ;;  %p766_p13 = por %p765_p12, %p764_p11 }
  0x72   :  { %638 = vmatprep.subr.bf16.mxu0 %v637_v50  ;;  %v363_v50 = vld [vmem:[#allocation7 + $0x78] sm:$0xff] }
  0x73   :  { %576 = vmatpush1.bf16.msra.mxu1 %v575_v56  ;;  %v675_v51 = vpack.c.bf16 %v363_v50, %v362_v49  ;;  %v200_v56 = vsub.s32 1, %v195_v53  ;;  %p767_p0 = pnand %p766_p13, %p760_p10 }
  0x74   :  { %578 = vmatprep.subr.bf16.mxu1 %v577_v58 }
  0x75   :  { %640 = vmatpush1.bf16.msra.mxu0 %v639_v57  ;;  %v197_v57 = vrot.slane %v192_v55, %v196_v54  ;;  %v201_v58 = vrot.slane %v192_v55, %v200_v56 }
  0x76   :  { %642 = vmatprep.subr.bf16.mxu0 %v641_v62 }
  0x77   :  { %580 = vmatpush1.bf16.msra.mxu1 %v579_v2 }
  0x78   :  { %646 = vmatprep.subr.bf16.mxu1 %v645_v4 }
  0x79   :  { %644 = vmatpush1.bf16.msra.mxu0 %v643_v3 }
  0x7a   :  { %269 = vmatmul.mubr.f32.vlgmr.msra.gmra.mrb[0].mxu1 %v60_v9 }
  0x7b   :  { %648 = vmatpush3.bf16.msra.mxu1 %v647_v10 }
  0x7c   :  { %340 = vmatmul.mubr.f32.vlgmr.msra.gmra.mrb[0].mxu0 %v62_v11  ;;  %650 = vmatprep.subr.bf16.mxu1 %v649_v12 }
  0x7f   :  { %652 = vmatpush3.bf16.msra.mxu1 %v651_v17 }
  0x80   :  { %654 = vmatprep.subr.bf16.mxu1 %v653_v18 }
  0x83   :  { %656 = vmatpush3.bf16.msra.mxu1 %v655_v23 }
  0x84   :  { %658 = vmatprep.subr.bf16.mxu1 %v657_v24 }
  0x87   :  { %660 = vmatpush3.bf16.msra.mxu1 %v659_v29 }
  0x88   :  { %662 = vmatprep.subr.bf16.mxu1 %v661_v30 }
  0x8b   :  { %664 = vmatpush3.bf16.msra.mxu1 %v663_v35 }
  0x8c   :  { %666 = vmatprep.subr.bf16.mxu1 %v665_v36 }
  0x8f   :  { %668 = vmatpush3.bf16.msra.mxu1 %v667_v39 }
  0x90   :  { %670 = vmatprep.subr.bf16.mxu1 %v669_v42 }
  0x93   :  { %672 = vmatpush3.bf16.msra.mxu1 %v671_v45 }
  0x94   :  { %674 = vmatprep.subr.bf16.mxu1 %v673_v48 }
  0x97   :  { %676 = vmatpush3.bf16.msra.mxu1 %v675_v51 }
 0x14d   :  { %v270_v59 = vpop.f32.mrb[0].mxu1 }
 0x14e   :  { %v271_v60 = vadd.f32 %v270_v59, %v197_v57  ;;  %v272_v61 = vpop.f32.mrb[1].mxu1 }
 0x14f   :  { %v341_v62 = vpop.f32.mrb[0].mxu0  ;;  %v273_v63 = vadd.f32 %v272_v61, %v201_v58 }
 0x150   :  { %v343_v0 = vpop.f32.mrb[1].mxu0  ;;  %v342_v1 = vadd.f32 %v341_v62, %v271_v60 }
 0x151   :  { %v344_v2 = vadd.f32 %v343_v0, %v273_v63 }
 0x152   :  { %v346_v4 = vmax.f32 %v342_v1, 0.0 }
 0x153   :  { %v347_v3 = vmax.f32 %v344_v2, 0.0 }
 0x155   :  { %451 = vmatprep.mubr.f32.mxu1 %v347_v3 }
 0x156   :  { %452 = vmatmul.mubr.f32.vlgmr.msra.gmra.mrb[2].mxu1 %v346_v4 }
 0x229   :  { %v514_v5 = vpop.f32.mrb[2].mxu1 }
 0x22a   :  { %v515_v7 = vpop.f32.mrb[3].mxu1 }
 0x22b   :  { %v516_v8 = vadd.f32 %v515_v7, %v514_v5 }
 0x22d   :  { %v454_v9 = vadd.f32 %v516_v8, %v480_v6 }
 0x22f   :  { %v481_v10 = vmul.f32 -1.442695, %v454_v9 }
 0x231   :  { %689 = vpow2.f32 %v481_v10 }
 0x23b   :  { %v690_v11 = vpop.eup %689 }
 0x23c   :  { %v460_v12 = vadd.f32 1.0, %v690_v11 }
 0x23e   :  { %691 = vrcp.f32 %v460_v12 }
 0x248   :  { %v692_v13 = vpop.eup %691 }
 0x249   :  { %463 = vst [vmem:[#allocation8] sm:$0xff] %v692_v13 }
 0x24a   :  { %770 = shalt.err (!%p767_p0)
}
 0x24b   :  { %s771_s12 = scalar_lea.hbm %s884_s5, 128 }
 0x24c   :  { %p772_p1 = scmp.ne.s32.totalorder %s884_s5, %s771_s12  ;;  %p775_p2 = scmp.lt.u32.totalorder %s771_s12, %s884_s5 }
 0x24e   :  { %p777_p3 = pnand %p775_p2, %p772_p1 }
 0x250   :  { %780 = shalt.err (!%p777_p3)
}
 0x251   :  { %473 = dma.vmem_to_hbm [thread:$0]  %s471_s9, 128, %s884_s5, [#allocation4]  }
 0x252   :  { %785 = dma.done.wait [#allocation4], 128  }
 0x253   :  { %786 = vsyncadd [#allocation4], 4294967168 }
 0x254   :  { %477 = vsyncpa [#allocation3], 1 }
 0x255   :  { %478 = vsyncpa [#allocation6], 1 }
 0x256   :  { %479 = vsyncpa [#allocation4], 1 }

</bundles_post_ra>
